<compile_context>
chip_gen: v7x
topology: tpu7x:2x2x1
jax: 0.10.0
libtpu: 0.0.40
codegen_flags: <defaults>
</compile_context>

<pallas_src>
import jax
import jax.numpy as jnp
from jax.experimental import pallas as pl
from jax.experimental.pallas import tpu as pltpu

# ----------------------------- config --------------------------------------
IMG = 16          # img_size
PATCH = 4         # patch_size
NP = (IMG // PATCH) ** 2     # n_patches = 16
ED = 32           # encode_dim
TOKEN_H = 16      # token_hidden_dim
CHAN_H = 32       # channel_hidden_dim
NUM_CLASSES = 10
VOTING = 4
NUM_BLOCKS = 2
BN_EPS = 1e-5
BATCH = 2
SLAB_W = 128      # lane width of the packed parameter slab / padded output


def _ceil8(n):
    return ((n + 7) // 8) * 8


# -------------------- parameter slab layout (static) ------------------------
def param_layout(batch):
    """name -> (row_offset, rows, cols) inside the single packed (R, 128) slab."""
    entries = {}
    off = 0

    def add(name, rows, cols):
        nonlocal off
        entries[name] = (off, rows, cols)
        off += _ceil8(rows)          # keep every block 8-row (sublane) aligned

    bn_rows = batch * NP
    add("w_emb", 3 * PATCH * PATCH, ED)
    add("emb_c", 1, ED)
    for blk in range(NUM_BLOCKS):
        add(f"w1t{blk}", TOKEN_H, NP)
        add(f"tb1_s{blk}", 1, ED)
        add(f"c1t{blk}", TOKEN_H, ED)
        add(f"w2t{blk}", NP, TOKEN_H)
        add(f"tb2_s{blk}", 1, ED)
        add(f"c2t{blk}", NP, ED)
        add(f"tsk_s{blk}", 1, ED)
        add(f"tsk_h{blk}", 1, ED)
        add(f"w1c{blk}", ED, CHAN_H)
        add(f"cb1_s{blk}", bn_rows, 1)
        add(f"c1c{blk}", bn_rows, CHAN_H)
        add(f"w2c{blk}", CHAN_H, ED)
        add(f"cb2_s{blk}", bn_rows, 1)
        add(f"c2c{blk}", bn_rows, ED)
        add(f"csk_s{blk}", bn_rows, 1)
        add(f"csk_h{blk}", bn_rows, 1)
    add("wavg", 1, NP)
    add("wc", ED, NUM_CLASSES * VOTING)
    add("bc2", 1, NUM_CLASSES * VOTING)
    add("vote", NUM_CLASSES * VOTING, SLAB_W)
    return entries, off


def pack_params(named, batch):
    entries, total_rows = param_layout(batch)
    slab = jnp.zeros((total_rows, SLAB_W), jnp.float32)
    for name, (r0, rows, cols) in entries.items():
        arr = jnp.asarray(named[name], jnp.float32)
        assert arr.shape == (rows, cols), (name, arr.shape, (rows, cols))
        slab = slab.at[r0:r0 + rows, :cols].set(arr)
    return slab


# -------------------- the single fused forward kernel ----------------------
def _build_kernel(batch, entries, out_rows):
    B = batch

    def read(w_ref, name):
        r0, rows, cols = entries[name]
        return w_ref[r0:r0 + rows, 0:cols]          # static, 8-row-aligned slice

    def kernel(p_ref, w_ref, o_ref):
        # ---- patcher conv + 1x1 encoder conv + BN2d (pre-folded) + IF spike
        x = jnp.dot(p_ref[...], read(w_ref, "w_emb"),
                    preferred_element_type=jnp.float32) + read(w_ref, "emb_c")
        x = (x >= 1.0).astype(jnp.float32)                    # (B*NP, ED)

        for blk in range(NUM_BLOCKS):
            # ---- token MlpBlock (torch runs it on x^T; done transpose-free,
            #      per image on statically sliced (NP, ED) tiles -- no kron).
            w1t = read(w_ref, f"w1t{blk}")                    # (Ht, NP)
            tb1_s = read(w_ref, f"tb1_s{blk}")                # (1, ED)
            c1t = read(w_ref, f"c1t{blk}")                    # (Ht, ED)
            w2t = read(w_ref, f"w2t{blk}")                    # (NP, Ht)
            tb2_s = read(w_ref, f"tb2_s{blk}")                # (1, ED)
            c2t = read(w_ref, f"c2t{blk}")                    # (NP, ED)
            tsk_s = read(w_ref, f"tsk_s{blk}")                # (1, ED)
            tsk_h = read(w_ref, f"tsk_h{blk}")                # (1, ED)

            h = x * tsk_s + tsk_h                             # skip BN1d(ED)
            zs = []
            for b in range(B):
                xb = x[b * NP:(b + 1) * NP, :]                # (NP, ED)
                zb = jnp.dot(w1t, xb, preferred_element_type=jnp.float32)
                zb = zb * tb1_s + c1t                         # Linear bias + BN1d(ED)
                zb = (zb >= 2.0).astype(jnp.float32)          # LIF spike
                zb = jnp.dot(w2t, zb, preferred_element_type=jnp.float32)
                zs.append(zb * tb2_s + c2t)                   # Linear bias + BN1d(ED)
            z = zs[0] if B == 1 else jnp.concatenate(zs, axis=0)
            x = ((z + h) >= 2.0).astype(jnp.float32)          # residual + LIF

            # ---- channel MlpBlock (plain row-wise matmuls over the whole batch)
            w1c = read(w_ref, f"w1c{blk}")                    # (ED, Hc)
            cb1_s = read(w_ref, f"cb1_s{blk}")                # (B*NP, 1)
            c1c = read(w_ref, f"c1c{blk}")                    # (B*NP, Hc)
            w2c = read(w_ref, f"w2c{blk}")                    # (Hc, ED)
            cb2_s = read(w_ref, f"cb2_s{blk}")                # (B*NP, 1)
            c2c = read(w_ref, f"c2c{blk}")                    # (B*NP, ED)
            csk_s = read(w_ref, f"csk_s{blk}")                # (B*NP, 1)
            csk_h = read(w_ref, f"csk_h{blk}")                # (B*NP, 1)

            h = x * csk_s + csk_h                             # skip BN1d(NP)
            z = jnp.dot(x, w1c, preferred_element_type=jnp.float32) * cb1_s + c1c
            z = (z >= 2.0).astype(jnp.float32)                # LIF spike
            z = jnp.dot(z, w2c, preferred_element_type=jnp.float32) * cb2_s + c2c
            x = ((z + h) >= 2.0).astype(jnp.float32)          # residual + LIF

        # ---- classifier: BN1d(NP) + mean-over-patches folded into wavg / bc2
        wavg = read(w_ref, "wavg")                            # (1, NP) = cls_s/NP
        wc = read(w_ref, "wc")                                # (ED, C*V)
        bc2 = read(w_ref, "bc2")                              # (1, C*V)
        vote = read(w_ref, "vote")                            # (C*V, 128)

        mrows = [jnp.dot(wavg, x[b * NP:(b + 1) * NP, :],
                         preferred_element_type=jnp.float32) for b in range(B)]
        if out_rows > B:                                      # pad -> full (8,128) store
            mrows.append(jnp.zeros((out_rows - B, ED), jnp.float32))
        m = jnp.concatenate(mrows, axis=0)                    # (out_rows, ED)
        z = jnp.dot(m, wc, preferred_element_type=jnp.float32) + bc2
        fr = 0.5 * (jnp.tanh(z - 2.0) + 1.0)                  # == sigmoid(2z-4), on EUP
        o_ref[...] = jnp.dot(fr, vote, preferred_element_type=jnp.float32)

    return kernel


@jax.jit
def mixer_net_forward(img, slab):
    """img: (B, 3, IMG, IMG) NCHW, slab: packed params -> logits (B, NUM_CLASSES)."""
    B = img.shape[0]
    Hp = IMG // PATCH
    entries, total_rows = param_layout(B)
    assert slab.shape == (total_rows, SLAB_W), (slab.shape, (total_rows, SLAB_W))

    # Patch extraction is pure layout glue; allow_input_fusion lets XLA fuse it
    # into the pallas_call input instead of launching a separate transpose kernel.
    p = img.reshape(B, 3, Hp, PATCH, Hp, PATCH)
    p = p.transpose(0, 2, 4, 1, 3, 5).reshape(B * NP, 3 * PATCH * PATCH)

    out_rows = max(8, _ceil8(B))
    kernel = _build_kernel(B, entries, out_rows)
    vmem = pl.BlockSpec(memory_space=pltpu.MemorySpace.VMEM)
    out = pl.pallas_call(
        kernel,
        out_shape=jax.ShapeDtypeStruct((out_rows, SLAB_W), jnp.float32),
        in_specs=[vmem, vmem],
        out_specs=vmem,
        compiler_params=pltpu.CompilerParams(
            allow_input_fusion=[True, False],   # fuse the patch transpose into input 0
        ),
    )(p, slab)
    return out[:B, :NUM_CLASSES]


# ------------------------------ params --------------------------------------
def init_params(key, batch=BATCH):
    """Create PyTorch-layout parameters, fold all foldable algebra offline and
    pack everything into ONE lane-dense (R, 128) f32 slab (single input DMA)."""
    ks = iter(jax.random.split(key, 160))

    def nrm(shape, scale):
        return scale * jax.random.normal(next(ks), shape, dtype=jnp.float32)

    def bn(c):
        gamma = 1.0 + 0.1 * jax.random.normal(next(ks), (c,), jnp.float32)
        beta = 0.1 * jax.random.normal(next(ks), (c,), jnp.float32)
        mean = 0.1 * jax.random.normal(next(ks), (c,), jnp.float32)
        var = jax.random.uniform(next(ks), (c,), jnp.float32, minval=0.5, maxval=1.5)
        s = gamma / jnp.sqrt(var + BN_EPS)
        return s, beta - mean * s

    B = batch
    named = {}

    # patcher Conv2d(3, ED//2, k=P, s=P, bias=False) + encoder Conv2d(ED//2, ED, 1)
    # + BatchNorm2d(ED): folded into one (3*P*P, ED) matrix and a (1, ED) constant.
    wpat = nrm((ED // 2, 3, PATCH, PATCH), (3 * PATCH * PATCH) ** -0.5)
    wp = wpat.reshape(ED // 2, -1).T                               # (3*P*P, ED//2)
    wenc = nrm((ED, ED // 2, 1, 1), (ED // 2) ** -0.5).reshape(ED, ED // 2).T
    be = nrm((ED,), 0.1)
    enc_s, enc_h = bn(ED)
    named["w_emb"] = (wp @ wenc) * enc_s[None, :]
    named["emb_c"] = (be * enc_s + enc_h)[None, :]

    for blk in range(NUM_BLOCKS):
        # token MlpBlock: Linear(NP, Ht), Linear(Ht, NP), 3x BN1d(ED)
        w1t = nrm((TOKEN_H, NP), NP ** -0.5)
        b1t = nrm((TOKEN_H,), 0.1)
        w2t = nrm((NP, TOKEN_H), TOKEN_H ** -0.5)
        b2t = nrm((NP,), 0.1)
        tsk_s, tsk_h = bn(ED)
        tb1_s, tb1_h = bn(ED)
        tb2_s, tb2_h = bn(ED)
        # channel MlpBlock: Linear(ED, Hc), Linear(Hc, ED), 3x BN1d(NP)
        w1c = nrm((CHAN_H, ED), ED ** -0.5)
        b1c = nrm((CHAN_H,), 0.1)
        w2c = nrm((ED, CHAN_H), CHAN_H ** -0.5)
        b2c = nrm((ED,), 0.1)
        csk_s, csk_h = bn(NP)
        cb1_s, cb1_h = bn(NP)
        cb2_s, cb2_h = bn(NP)

        # token block: weights kept batch-independent; bias + BN fused per (h,d)/(k,d)
        named[f"w1t{blk}"] = w1t                                   # (Ht, NP)
        named[f"tb1_s{blk}"] = tb1_s[None, :]
        named[f"c1t{blk}"] = b1t[:, None] * tb1_s[None, :] + tb1_h[None, :]
        named[f"w2t{blk}"] = w2t                                   # (NP, Ht)
        named[f"tb2_s{blk}"] = tb2_s[None, :]
        named[f"c2t{blk}"] = b2t[:, None] * tb2_s[None, :] + tb2_h[None, :]
        named[f"tsk_s{blk}"] = tsk_s[None, :]
        named[f"tsk_h{blk}"] = tsk_h[None, :]

        # channel block: per-patch BN constants tiled across the batch rows
        named[f"w1c{blk}"] = w1c.T                                 # (ED, Hc)
        named[f"cb1_s{blk}"] = jnp.tile(cb1_s, B)[:, None]
        named[f"c1c{blk}"] = (jnp.tile(cb1_s, B)[:, None] * b1c[None, :]
                              + jnp.tile(cb1_h, B)[:, None])
        named[f"w2c{blk}"] = w2c.T                                 # (Hc, ED)
        named[f"cb2_s{blk}"] = jnp.tile(cb2_s, B)[:, None]
        named[f"c2c{blk}"] = (jnp.tile(cb2_s, B)[:, None] * b2c[None, :]
                              + jnp.tile(cb2_h, B)[:, None])
        named[f"csk_s{blk}"] = jnp.tile(csk_s, B)[:, None]
        named[f"csk_h{blk}"] = jnp.tile(csk_h, B)[:, None]

    # classifier: BN1d(NP) + mean-over-patches folded into wavg / bc2
    cls_s, cls_h = bn(NP)
    named["wavg"] = (cls_s / NP)[None, :]                          # (1, NP)
    c_mean = jnp.mean(cls_h)
    wc = nrm((NUM_CLASSES * VOTING, ED), ED ** -0.5).T             # (ED, C*V)
    bc = nrm((NUM_CLASSES * VOTING,), 0.1)
    named["wc"] = wc
    named["bc2"] = (bc + c_mean * jnp.sum(wc, axis=0))[None, :]    # (1, C*V)
    vote = jnp.repeat(jnp.eye(NUM_CLASSES, dtype=jnp.float32), VOTING, axis=0) / VOTING
    named["vote"] = jnp.pad(vote, ((0, 0), (0, SLAB_W - NUM_CLASSES)))  # lane-dense
    return pack_params(named, batch)


if __name__ == "__main__":
    key = jax.random.PRNGKey(0)
    k_param, k_img = jax.random.split(key)
    slab = init_params(k_param, batch=BATCH)
    x = jax.random.normal(k_img, (BATCH, 3, IMG, IMG), dtype=jnp.float32)
    out = mixer_net_forward(x, slab)
    out = jax.block_until_ready(out)
    assert out.shape == (BATCH, NUM_CLASSES)
    assert bool(jnp.all(jnp.isfinite(out)))
    print("KERNEL_OK")
</pallas_src>

<mosaic_0001>
module attributes {stable_mosaic.version = 11 : i64} {
  func.func @kernel(%arg0: memref<32x48xf32, #tpu.memory_space<vmem>>, %arg1: memref<848x128xf32, #tpu.memory_space<vmem>>, %arg2: memref<8x128xf32, #tpu.memory_space<vmem>>) attributes {dimension_semantics = [], scalar_prefetch = 0 : i64, scratch_operands = 0 : i64, tpu.core_type = #tpu.core_type<tc>} {
    %c0 = arith.constant 0 : index
    %c0_0 = arith.constant 0 : index
    %0 = vector.load %arg0[%c0, %c0_0] : memref<32x48xf32, #tpu.memory_space<vmem>>, vector<32x48xf32>
    %c0_1 = arith.constant 0 : index
    %c0_2 = arith.constant 0 : index
    %1 = vector.load %arg1[%c0_1, %c0_2] : memref<848x128xf32, #tpu.memory_space<vmem>>, vector<48x32xf32>
    %cst = arith.constant dense<0.000000e+00> : vector<32x32xf32>
    %2 = tpu.matmul %0, %1, %cst {dimension_numbers = #tpu.dot_dimension_numbers<[1], [0], [0], [1], [0, 0, 1, 1], [], []>} : vector<32x48xf32>, vector<48x32xf32>, vector<32x32xf32> -> vector<32x32xf32>
    %c48 = arith.constant 48 : index
    %c0_3 = arith.constant 0 : index
    %3 = vector.load %arg1[%c48, %c0_3] : memref<848x128xf32, #tpu.memory_space<vmem>>, vector<1x32xf32>
    %4 = vector.broadcast %3 : vector<1x32xf32> to vector<32x32xf32>
    %5 = arith.addf %2, %4 : vector<32x32xf32>
    %cst_4 = arith.constant 1.000000e+00 : f32
    %6 = vector.broadcast %cst_4 : f32 to vector<32x32xf32>
    %7 = arith.cmpf oge, %5, %6 : vector<32x32xf32>
    %8 = arith.extui %7 : vector<32x32xi1> to vector<32x32xi32>
    %9 = arith.sitofp %8 : vector<32x32xi32> to vector<32x32xf32>
    %c56 = arith.constant 56 : index
    %c0_5 = arith.constant 0 : index
    %10 = vector.load %arg1[%c56, %c0_5] : memref<848x128xf32, #tpu.memory_space<vmem>>, vector<16x16xf32>
    %c72 = arith.constant 72 : index
    %c0_6 = arith.constant 0 : index
    %11 = vector.load %arg1[%c72, %c0_6] : memref<848x128xf32, #tpu.memory_space<vmem>>, vector<1x32xf32>
    %c80 = arith.constant 80 : index
    %c0_7 = arith.constant 0 : index
    %12 = vector.load %arg1[%c80, %c0_7] : memref<848x128xf32, #tpu.memory_space<vmem>>, vector<16x32xf32>
    %c96 = arith.constant 96 : index
    %c0_8 = arith.constant 0 : index
    %13 = vector.load %arg1[%c96, %c0_8] : memref<848x128xf32, #tpu.memory_space<vmem>>, vector<16x16xf32>
    %c112 = arith.constant 112 : index
    %c0_9 = arith.constant 0 : index
    %14 = vector.load %arg1[%c112, %c0_9] : memref<848x128xf32, #tpu.memory_space<vmem>>, vector<1x32xf32>
    %c120 = arith.constant 120 : index
    %c0_10 = arith.constant 0 : index
    %15 = vector.load %arg1[%c120, %c0_10] : memref<848x128xf32, #tpu.memory_space<vmem>>, vector<16x32xf32>
    %c136 = arith.constant 136 : index
    %c0_11 = arith.constant 0 : index
    %16 = vector.load %arg1[%c136, %c0_11] : memref<848x128xf32, #tpu.memory_space<vmem>>, vector<1x32xf32>
    %c144 = arith.constant 144 : index
    %c0_12 = arith.constant 0 : index
    %17 = vector.load %arg1[%c144, %c0_12] : memref<848x128xf32, #tpu.memory_space<vmem>>, vector<1x32xf32>
    %18 = vector.broadcast %16 : vector<1x32xf32> to vector<32x32xf32>
    %19 = arith.mulf %9, %18 : vector<32x32xf32>
    %20 = vector.broadcast %17 : vector<1x32xf32> to vector<32x32xf32>
    %21 = arith.addf %19, %20 : vector<32x32xf32>
    %22 = vector.extract_strided_slice %9 {offsets = [0, 0], sizes = [16, 32], strides = [1, 1]} : vector<32x32xf32> to vector<16x32xf32>
    %cst_13 = arith.constant dense<0.000000e+00> : vector<16x32xf32>
    %23 = tpu.matmul %10, %22, %cst_13 {dimension_numbers = #tpu.dot_dimension_numbers<[1], [0], [0], [1], [0, 0, 1, 1], [], []>} : vector<16x16xf32>, vector<16x32xf32>, vector<16x32xf32> -> vector<16x32xf32>
    %24 = vector.broadcast %11 : vector<1x32xf32> to vector<16x32xf32>
    %25 = arith.mulf %23, %24 : vector<16x32xf32>
    %26 = arith.addf %25, %12 : vector<16x32xf32>
    %cst_14 = arith.constant 2.000000e+00 : f32
    %27 = vector.broadcast %cst_14 : f32 to vector<16x32xf32>
    %28 = arith.cmpf oge, %26, %27 : vector<16x32xf32>
    %29 = arith.extui %28 : vector<16x32xi1> to vector<16x32xi32>
    %30 = arith.sitofp %29 : vector<16x32xi32> to vector<16x32xf32>
    %cst_15 = arith.constant dense<0.000000e+00> : vector<16x32xf32>
    %31 = tpu.matmul %13, %30, %cst_15 {dimension_numbers = #tpu.dot_dimension_numbers<[1], [0], [0], [1], [0, 0, 1, 1], [], []>} : vector<16x16xf32>, vector<16x32xf32>, vector<16x32xf32> -> vector<16x32xf32>
    %32 = vector.broadcast %14 : vector<1x32xf32> to vector<16x32xf32>
    %33 = arith.mulf %31, %32 : vector<16x32xf32>
    %34 = arith.addf %33, %15 : vector<16x32xf32>
    %35 = vector.extract_strided_slice %9 {offsets = [16, 0], sizes = [16, 32], strides = [1, 1]} : vector<32x32xf32> to vector<16x32xf32>
    %cst_16 = arith.constant dense<0.000000e+00> : vector<16x32xf32>
    %36 = tpu.matmul %10, %35, %cst_16 {dimension_numbers = #tpu.dot_dimension_numbers<[1], [0], [0], [1], [0, 0, 1, 1], [], []>} : vector<16x16xf32>, vector<16x32xf32>, vector<16x32xf32> -> vector<16x32xf32>
    %37 = vector.broadcast %11 : vector<1x32xf32> to vector<16x32xf32>
    %38 = arith.mulf %36, %37 : vector<16x32xf32>
    %39 = arith.addf %38, %12 : vector<16x32xf32>
    %cst_17 = arith.constant 2.000000e+00 : f32
    %40 = vector.broadcast %cst_17 : f32 to vector<16x32xf32>
    %41 = arith.cmpf oge, %39, %40 : vector<16x32xf32>
    %42 = arith.extui %41 : vector<16x32xi1> to vector<16x32xi32>
    %43 = arith.sitofp %42 : vector<16x32xi32> to vector<16x32xf32>
    %cst_18 = arith.constant dense<0.000000e+00> : vector<16x32xf32>
    %44 = tpu.matmul %13, %43, %cst_18 {dimension_numbers = #tpu.dot_dimension_numbers<[1], [0], [0], [1], [0, 0, 1, 1], [], []>} : vector<16x16xf32>, vector<16x32xf32>, vector<16x32xf32> -> vector<16x32xf32>
    %45 = vector.broadcast %14 : vector<1x32xf32> to vector<16x32xf32>
    %46 = arith.mulf %44, %45 : vector<16x32xf32>
    %47 = arith.addf %46, %15 : vector<16x32xf32>
    %48 = tpu.concatenate %34, %47 in 0 : vector<16x32xf32>, vector<16x32xf32> -> vector<32x32xf32>
    %49 = arith.addf %48, %21 : vector<32x32xf32>
    %cst_19 = arith.constant 2.000000e+00 : f32
    %50 = vector.broadcast %cst_19 : f32 to vector<32x32xf32>
    %51 = arith.cmpf oge, %49, %50 : vector<32x32xf32>
    %52 = arith.extui %51 : vector<32x32xi1> to vector<32x32xi32>
    %53 = arith.sitofp %52 : vector<32x32xi32> to vector<32x32xf32>
    %c152 = arith.constant 152 : index
    %c0_20 = arith.constant 0 : index
    %54 = vector.load %arg1[%c152, %c0_20] : memref<848x128xf32, #tpu.memory_space<vmem>>, vector<32x32xf32>
    %c184 = arith.constant 184 : index
    %c0_21 = arith.constant 0 : index
    %55 = vector.load %arg1[%c184, %c0_21] : memref<848x128xf32, #tpu.memory_space<vmem>>, vector<32x1xf32>
    %c216 = arith.constant 216 : index
    %c0_22 = arith.constant 0 : index
    %56 = vector.load %arg1[%c216, %c0_22] : memref<848x128xf32, #tpu.memory_space<vmem>>, vector<32x32xf32>
    %c248 = arith.constant 248 : index
    %c0_23 = arith.constant 0 : index
    %57 = vector.load %arg1[%c248, %c0_23] : memref<848x128xf32, #tpu.memory_space<vmem>>, vector<32x32xf32>
    %c280 = arith.constant 280 : index
    %c0_24 = arith.constant 0 : index
    %58 = vector.load %arg1[%c280, %c0_24] : memref<848x128xf32, #tpu.memory_space<vmem>>, vector<32x1xf32>
    %c312 = arith.constant 312 : index
    %c0_25 = arith.constant 0 : index
    %59 = vector.load %arg1[%c312, %c0_25] : memref<848x128xf32, #tpu.memory_space<vmem>>, vector<32x32xf32>
    %c344 = arith.constant 344 : index
    %c0_26 = arith.constant 0 : index
    %60 = vector.load %arg1[%c344, %c0_26] : memref<848x128xf32, #tpu.memory_space<vmem>>, vector<32x1xf32>
    %c376 = arith.constant 376 : index
    %c0_27 = arith.constant 0 : index
    %61 = vector.load %arg1[%c376, %c0_27] : memref<848x128xf32, #tpu.memory_space<vmem>>, vector<32x1xf32>
    %62 = vector.broadcast %60 : vector<32x1xf32> to vector<32x32xf32>
    %63 = arith.mulf %53, %62 : vector<32x32xf32>
    %64 = vector.broadcast %61 : vector<32x1xf32> to vector<32x32xf32>
    %65 = arith.addf %63, %64 : vector<32x32xf32>
    %cst_28 = arith.constant dense<0.000000e+00> : vector<32x32xf32>
    %66 = tpu.matmul %53, %54, %cst_28 {dimension_numbers = #tpu.dot_dimension_numbers<[1], [0], [0], [1], [0, 0, 1, 1], [], []>} : vector<32x32xf32>, vector<32x32xf32>, vector<32x32xf32> -> vector<32x32xf32>
    %67 = vector.broadcast %55 : vector<32x1xf32> to vector<32x32xf32>
    %68 = arith.mulf %66, %67 : vector<32x32xf32>
    %69 = arith.addf %68, %56 : vector<32x32xf32>
    %cst_29 = arith.constant 2.000000e+00 : f32
    %70 = vector.broadcast %cst_29 : f32 to vector<32x32xf32>
    %71 = arith.cmpf oge, %69, %70 : vector<32x32xf32>
    %72 = arith.extui %71 : vector<32x32xi1> to vector<32x32xi32>
    %73 = arith.sitofp %72 : vector<32x32xi32> to vector<32x32xf32>
    %cst_30 = arith.constant dense<0.000000e+00> : vector<32x32xf32>
    %74 = tpu.matmul %73, %57, %cst_30 {dimension_numbers = #tpu.dot_dimension_numbers<[1], [0], [0], [1], [0, 0, 1, 1], [], []>} : vector<32x32xf32>, vector<32x32xf32>, vector<32x32xf32> -> vector<32x32xf32>
    %75 = vector.broadcast %58 : vector<32x1xf32> to vector<32x32xf32>
    %76 = arith.mulf %74, %75 : vector<32x32xf32>
    %77 = arith.addf %76, %59 : vector<32x32xf32>
    %78 = arith.addf %77, %65 : vector<32x32xf32>
    %cst_31 = arith.constant 2.000000e+00 : f32
    %79 = vector.broadcast %cst_31 : f32 to vector<32x32xf32>
    %80 = arith.cmpf oge, %78, %79 : vector<32x32xf32>
    %81 = arith.extui %80 : vector<32x32xi1> to vector<32x32xi32>
    %82 = arith.sitofp %81 : vector<32x32xi32> to vector<32x32xf32>
    %c408 = arith.constant 408 : index
    %c0_32 = arith.constant 0 : index
    %83 = vector.load %arg1[%c408, %c0_32] : memref<848x128xf32, #tpu.memory_space<vmem>>, vector<16x16xf32>
    %c424 = arith.constant 424 : index
    %c0_33 = arith.constant 0 : index
    %84 = vector.load %arg1[%c424, %c0_33] : memref<848x128xf32, #tpu.memory_space<vmem>>, vector<1x32xf32>
    %c432 = arith.constant 432 : index
    %c0_34 = arith.constant 0 : index
    %85 = vector.load %arg1[%c432, %c0_34] : memref<848x128xf32, #tpu.memory_space<vmem>>, vector<16x32xf32>
    %c448 = arith.constant 448 : index
    %c0_35 = arith.constant 0 : index
    %86 = vector.load %arg1[%c448, %c0_35] : memref<848x128xf32, #tpu.memory_space<vmem>>, vector<16x16xf32>
    %c464 = arith.constant 464 : index
    %c0_36 = arith.constant 0 : index
    %87 = vector.load %arg1[%c464, %c0_36] : memref<848x128xf32, #tpu.memory_space<vmem>>, vector<1x32xf32>
    %c472 = arith.constant 472 : index
    %c0_37 = arith.constant 0 : index
    %88 = vector.load %arg1[%c472, %c0_37] : memref<848x128xf32, #tpu.memory_space<vmem>>, vector<16x32xf32>
    %c488 = arith.constant 488 : index
    %c0_38 = arith.constant 0 : index
    %89 = vector.load %arg1[%c488, %c0_38] : memref<848x128xf32, #tpu.memory_space<vmem>>, vector<1x32xf32>
    %c496 = arith.constant 496 : index
    %c0_39 = arith.constant 0 : index
    %90 = vector.load %arg1[%c496, %c0_39] : memref<848x128xf32, #tpu.memory_space<vmem>>, vector<1x32xf32>
    %91 = vector.broadcast %89 : vector<1x32xf32> to vector<32x32xf32>
    %92 = arith.mulf %82, %91 : vector<32x32xf32>
    %93 = vector.broadcast %90 : vector<1x32xf32> to vector<32x32xf32>
    %94 = arith.addf %92, %93 : vector<32x32xf32>
    %95 = vector.extract_strided_slice %82 {offsets = [0, 0], sizes = [16, 32], strides = [1, 1]} : vector<32x32xf32> to vector<16x32xf32>
    %cst_40 = arith.constant dense<0.000000e+00> : vector<16x32xf32>
    %96 = tpu.matmul %83, %95, %cst_40 {dimension_numbers = #tpu.dot_dimension_numbers<[1], [0], [0], [1], [0, 0, 1, 1], [], []>} : vector<16x16xf32>, vector<16x32xf32>, vector<16x32xf32> -> vector<16x32xf32>
    %97 = vector.broadcast %84 : vector<1x32xf32> to vector<16x32xf32>
    %98 = arith.mulf %96, %97 : vector<16x32xf32>
    %99 = arith.addf %98, %85 : vector<16x32xf32>
    %cst_41 = arith.constant 2.000000e+00 : f32
    %100 = vector.broadcast %cst_41 : f32 to vector<16x32xf32>
    %101 = arith.cmpf oge, %99, %100 : vector<16x32xf32>
    %102 = arith.extui %101 : vector<16x32xi1> to vector<16x32xi32>
    %103 = arith.sitofp %102 : vector<16x32xi32> to vector<16x32xf32>
    %cst_42 = arith.constant dense<0.000000e+00> : vector<16x32xf32>
    %104 = tpu.matmul %86, %103, %cst_42 {dimension_numbers = #tpu.dot_dimension_numbers<[1], [0], [0], [1], [0, 0, 1, 1], [], []>} : vector<16x16xf32>, vector<16x32xf32>, vector<16x32xf32> -> vector<16x32xf32>
    %105 = vector.broadcast %87 : vector<1x32xf32> to vector<16x32xf32>
    %106 = arith.mulf %104, %105 : vector<16x32xf32>
    %107 = arith.addf %106, %88 : vector<16x32xf32>
    %108 = vector.extract_strided_slice %82 {offsets = [16, 0], sizes = [16, 32], strides = [1, 1]} : vector<32x32xf32> to vector<16x32xf32>
    %cst_43 = arith.constant dense<0.000000e+00> : vector<16x32xf32>
    %109 = tpu.matmul %83, %108, %cst_43 {dimension_numbers = #tpu.dot_dimension_numbers<[1], [0], [0], [1], [0, 0, 1, 1], [], []>} : vector<16x16xf32>, vector<16x32xf32>, vector<16x32xf32> -> vector<16x32xf32>
    %110 = vector.broadcast %84 : vector<1x32xf32> to vector<16x32xf32>
    %111 = arith.mulf %109, %110 : vector<16x32xf32>
    %112 = arith.addf %111, %85 : vector<16x32xf32>
    %cst_44 = arith.constant 2.000000e+00 : f32
    %113 = vector.broadcast %cst_44 : f32 to vector<16x32xf32>
    %114 = arith.cmpf oge, %112, %113 : vector<16x32xf32>
    %115 = arith.extui %114 : vector<16x32xi1> to vector<16x32xi32>
    %116 = arith.sitofp %115 : vector<16x32xi32> to vector<16x32xf32>
    %cst_45 = arith.constant dense<0.000000e+00> : vector<16x32xf32>
    %117 = tpu.matmul %86, %116, %cst_45 {dimension_numbers = #tpu.dot_dimension_numbers<[1], [0], [0], [1], [0, 0, 1, 1], [], []>} : vector<16x16xf32>, vector<16x32xf32>, vector<16x32xf32> -> vector<16x32xf32>
    %118 = vector.broadcast %87 : vector<1x32xf32> to vector<16x32xf32>
    %119 = arith.mulf %117, %118 : vector<16x32xf32>
    %120 = arith.addf %119, %88 : vector<16x32xf32>
    %121 = tpu.concatenate %107, %120 in 0 : vector<16x32xf32>, vector<16x32xf32> -> vector<32x32xf32>
    %122 = arith.addf %121, %94 : vector<32x32xf32>
    %cst_46 = arith.constant 2.000000e+00 : f32
    %123 = vector.broadcast %cst_46 : f32 to vector<32x32xf32>
    %124 = arith.cmpf oge, %122, %123 : vector<32x32xf32>
    %125 = arith.extui %124 : vector<32x32xi1> to vector<32x32xi32>
    %126 = arith.sitofp %125 : vector<32x32xi32> to vector<32x32xf32>
    %c504 = arith.constant 504 : index
    %c0_47 = arith.constant 0 : index
    %127 = vector.load %arg1[%c504, %c0_47] : memref<848x128xf32, #tpu.memory_space<vmem>>, vector<32x32xf32>
    %c536 = arith.constant 536 : index
    %c0_48 = arith.constant 0 : index
    %128 = vector.load %arg1[%c536, %c0_48] : memref<848x128xf32, #tpu.memory_space<vmem>>, vector<32x1xf32>
    %c568 = arith.constant 568 : index
    %c0_49 = arith.constant 0 : index
    %129 = vector.load %arg1[%c568, %c0_49] : memref<848x128xf32, #tpu.memory_space<vmem>>, vector<32x32xf32>
    %c600 = arith.constant 600 : index
    %c0_50 = arith.constant 0 : index
    %130 = vector.load %arg1[%c600, %c0_50] : memref<848x128xf32, #tpu.memory_space<vmem>>, vector<32x32xf32>
    %c632 = arith.constant 632 : index
    %c0_51 = arith.constant 0 : index
    %131 = vector.load %arg1[%c632, %c0_51] : memref<848x128xf32, #tpu.memory_space<vmem>>, vector<32x1xf32>
    %c664 = arith.constant 664 : index
    %c0_52 = arith.constant 0 : index
    %132 = vector.load %arg1[%c664, %c0_52] : memref<848x128xf32, #tpu.memory_space<vmem>>, vector<32x32xf32>
    %c696 = arith.constant 696 : index
    %c0_53 = arith.constant 0 : index
    %133 = vector.load %arg1[%c696, %c0_53] : memref<848x128xf32, #tpu.memory_space<vmem>>, vector<32x1xf32>
    %c728 = arith.constant 728 : index
    %c0_54 = arith.constant 0 : index
    %134 = vector.load %arg1[%c728, %c0_54] : memref<848x128xf32, #tpu.memory_space<vmem>>, vector<32x1xf32>
    %135 = vector.broadcast %133 : vector<32x1xf32> to vector<32x32xf32>
    %136 = arith.mulf %126, %135 : vector<32x32xf32>
    %137 = vector.broadcast %134 : vector<32x1xf32> to vector<32x32xf32>
    %138 = arith.addf %136, %137 : vector<32x32xf32>
    %cst_55 = arith.constant dense<0.000000e+00> : vector<32x32xf32>
    %139 = tpu.matmul %126, %127, %cst_55 {dimension_numbers = #tpu.dot_dimension_numbers<[1], [0], [0], [1], [0, 0, 1, 1], [], []>} : vector<32x32xf32>, vector<32x32xf32>, vector<32x32xf32> -> vector<32x32xf32>
    %140 = vector.broadcast %128 : vector<32x1xf32> to vector<32x32xf32>
    %141 = arith.mulf %139, %140 : vector<32x32xf32>
    %142 = arith.addf %141, %129 : vector<32x32xf32>
    %cst_56 = arith.constant 2.000000e+00 : f32
    %143 = vector.broadcast %cst_56 : f32 to vector<32x32xf32>
    %144 = arith.cmpf oge, %142, %143 : vector<32x32xf32>
    %145 = arith.extui %144 : vector<32x32xi1> to vector<32x32xi32>
    %146 = arith.sitofp %145 : vector<32x32xi32> to vector<32x32xf32>
    %cst_57 = arith.constant dense<0.000000e+00> : vector<32x32xf32>
    %147 = tpu.matmul %146, %130, %cst_57 {dimension_numbers = #tpu.dot_dimension_numbers<[1], [0], [0], [1], [0, 0, 1, 1], [], []>} : vector<32x32xf32>, vector<32x32xf32>, vector<32x32xf32> -> vector<32x32xf32>
    %148 = vector.broadcast %131 : vector<32x1xf32> to vector<32x32xf32>
    %149 = arith.mulf %147, %148 : vector<32x32xf32>
    %150 = arith.addf %149, %132 : vector<32x32xf32>
    %151 = arith.addf %150, %138 : vector<32x32xf32>
    %cst_58 = arith.constant 2.000000e+00 : f32
    %152 = vector.broadcast %cst_58 : f32 to vector<32x32xf32>
    %153 = arith.cmpf oge, %151, %152 : vector<32x32xf32>
    %154 = arith.extui %153 : vector<32x32xi1> to vector<32x32xi32>
    %155 = arith.sitofp %154 : vector<32x32xi32> to vector<32x32xf32>
    %c760 = arith.constant 760 : index
    %c0_59 = arith.constant 0 : index
    %156 = vector.load %arg1[%c760, %c0_59] : memref<848x128xf32, #tpu.memory_space<vmem>>, vector<1x16xf32>
    %c768 = arith.constant 768 : index
    %c0_60 = arith.constant 0 : index
    %157 = vector.load %arg1[%c768, %c0_60] : memref<848x128xf32, #tpu.memory_space<vmem>>, vector<32x40xf32>
    %c800 = arith.constant 800 : index
    %c0_61 = arith.constant 0 : index
    %158 = vector.load %arg1[%c800, %c0_61] : memref<848x128xf32, #tpu.memory_space<vmem>>, vector<1x40xf32>
    %c808 = arith.constant 808 : index
    %c0_62 = arith.constant 0 : index
    %159 = vector.load %arg1[%c808, %c0_62] : memref<848x128xf32, #tpu.memory_space<vmem>>, vector<40x128xf32>
    %160 = vector.extract_strided_slice %155 {offsets = [0, 0], sizes = [16, 32], strides = [1, 1]} : vector<32x32xf32> to vector<16x32xf32>
    %cst_63 = arith.constant dense<0.000000e+00> : vector<1x32xf32>
    %161 = tpu.matmul %156, %160, %cst_63 {dimension_numbers = #tpu.dot_dimension_numbers<[1], [0], [0], [1], [0, 0, 1, 1], [], []>} : vector<1x16xf32>, vector<16x32xf32>, vector<1x32xf32> -> vector<1x32xf32>
    %162 = vector.extract_strided_slice %155 {offsets = [16, 0], sizes = [16, 32], strides = [1, 1]} : vector<32x32xf32> to vector<16x32xf32>
    %cst_64 = arith.constant dense<0.000000e+00> : vector<1x32xf32>
    %163 = tpu.matmul %156, %162, %cst_64 {dimension_numbers = #tpu.dot_dimension_numbers<[1], [0], [0], [1], [0, 0, 1, 1], [], []>} : vector<1x16xf32>, vector<16x32xf32>, vector<1x32xf32> -> vector<1x32xf32>
    %cst_65 = arith.constant 0.000000e+00 : f32
    %164 = vector.broadcast %cst_65 : f32 to vector<6x32xf32>
    %165 = tpu.concatenate %161, %163, %164 in 0 : vector<1x32xf32>, vector<1x32xf32>, vector<6x32xf32> -> vector<8x32xf32>
    %cst_66 = arith.constant dense<0.000000e+00> : vector<8x40xf32>
    %166 = tpu.matmul %165, %157, %cst_66 {dimension_numbers = #tpu.dot_dimension_numbers<[1], [0], [0], [1], [0, 0, 1, 1], [], []>} : vector<8x32xf32>, vector<32x40xf32>, vector<8x40xf32> -> vector<8x40xf32>
    %167 = vector.broadcast %158 : vector<1x40xf32> to vector<8x40xf32>
    %168 = arith.addf %166, %167 : vector<8x40xf32>
    %cst_67 = arith.constant 2.000000e+00 : f32
    %169 = vector.broadcast %cst_67 : f32 to vector<8x40xf32>
    %170 = arith.subf %168, %169 : vector<8x40xf32>
    %171 = math.tanh %170 : vector<8x40xf32>
    %cst_68 = arith.constant 1.000000e+00 : f32
    %172 = vector.broadcast %cst_68 : f32 to vector<8x40xf32>
    %173 = arith.addf %171, %172 : vector<8x40xf32>
    %cst_69 = arith.constant 5.000000e-01 : f32
    %174 = vector.broadcast %cst_69 : f32 to vector<8x40xf32>
    %175 = arith.mulf %174, %173 : vector<8x40xf32>
    %cst_70 = arith.constant dense<0.000000e+00> : vector<8x128xf32>
    %176 = tpu.matmul %175, %159, %cst_70 {dimension_numbers = #tpu.dot_dimension_numbers<[1], [0], [0], [1], [0, 0, 1, 1], [], []>} : vector<8x40xf32>, vector<40x128xf32>, vector<8x128xf32> -> vector<8x128xf32>
    %c0_71 = arith.constant 0 : index
    %c0_72 = arith.constant 0 : index
    %177 = vector.load %arg2[%c0_71, %c0_72] : memref<8x128xf32, #tpu.memory_space<vmem>>, vector<8x128xf32>
    tpu.vector_store %arg2[%c0_71, %c0_72], %176 {strides = array<i32>} : memref<8x128xf32, #tpu.memory_space<vmem>>, vector<8x128xf32>,
    return
  }
}

</mosaic_0001>

<bundles_post_ra>
// kernel: mixer_net_forward.1
= control target key start
LH: loop header
LB: loop body
LE: loop exit
PB: predicated region body
PF: predicated region fallthrough
CT: control target
= control target key end

     0   :  { %vm26_vm0 = vcmask 392192   ;;  %vm164_vm1 = vcmask 130048   ;;  %v2428_v19 = vmov 1.0|1.0   ;;  %v2429_v29 = vmov 0   ;;  %s3013_s1 = inlined_call_operand.vmem [shape: f32[848,128], index: 1, kind: input, shape index: {}]   ;;  %s3014_s0 = inlined_call_operand.vmem [shape: f32[32,48], index: 0, kind: input, shape index: {}]   ;;  %s3015_s2 = inlined_call_operand.vmem [shape: f32[8,128], index: 2, kind: output, shape index: {}]  }
   0x1   :  { %v15_v0 = vld [vmem:[%s3013_s1] sm:$0xff]  ;;  %v16_v1 = vld [vmem:[%s3013_s1 + $0x8] sm:$0xff]  ;;  %v17_v2 = vld [vmem:[%s3013_s1 + $0x10] sm:$0xff]  ;;  %2425 = vset.pattern.permute.xlu1 %v2429_v29  ;;  %2424 = vset.pattern.permute.xlu0 %v2429_v29  ;;  %v2430_v60 = vmov 0.0   ;;  %vm609_vm12 = vcmask 261120  }
   0x2   :  { %v2325_v3 = vpack.c.bf16 %v16_v1, %v15_v0  ;;  %v18_v4 = vld [vmem:[%s3013_s1 + $0x18] sm:$0xff]  ;;  %v19_v6 = vld [vmem:[%s3013_s1 + $0x20] sm:$0xff]  ;;  %v20_v7 = vld [vmem:[%s3013_s1 + $0x28] sm:$0xff] }
   0x3   :  { %v2329_v5 = vpack.c.bf16 %v18_v4, %v17_v2  ;;  %v11_v8 = vld [vmem:[%s3014_s0] sm:$0xff]  ;;  %v2333_v9 = vpack.c.bf16 %v20_v7, %v19_v6  ;;  %v12_v10 = vld [vmem:[%s3014_s0 + $0x8] sm:$0xff]  ;;  %v2477_v11 = vld [vmem:[%s3013_s1 + $0x38] sm:$0xff] }
   0x4   :  { %2326 = vmatprep.subr.bf16.mxu0 %v2325_v3  ;;  %2169 = vmatprep.mubr.msk.f32.mxu0 %vm26_vm0, %v11_v8  ;;  %v13_v12 = vld [vmem:[%s3014_s0 + $0x10] sm:$0xff]  ;;  %v14_v13 = vld [vmem:[%s3014_s0 + $0x18] sm:$0xff]  ;;  %v137_v20 = vld [vmem:[%s3013_s1 + $0x40] sm:$0xff] }
   0x5   :  { %2328 = vmatpush3.bf16.msra.mxu0 %v2325_v3  ;;  %2179 = vmatprep.mubr.msk.f32.mxu1 %vm164_vm1, %v2477_v11  ;;  %v1959_v14 = vld [vmem:[%s3013_s1 + $0x30] ss:$0 sm:$0xff]  ;;  %v141_v25 = vld [vmem:[%s3013_s1 + $0x60] sm:$0xff]  ;;  %v535_v27 = vld [vmem:[%s3013_s1 + $0xc8] sm:$0xff] }
   0x6   :  { %2330 = vmatprep.subr.bf16.mxu0 %v2329_v5  ;;  %v533_v28 = vld [vmem:[%s3013_s1 + $0xb8] sm:$0xff]  ;;  %719 = vperm.xlu1 %2425, %v535_v27   ;;  %v536_v30 = vld [vmem:[%s3013_s1 + $0xd0] sm:$0xff]  ;;  %v534_v31 = vld [vmem:[%s3013_s1 + $0xc0] sm:$0xff] }
   0x7   :  { %709 = vperm.xlu0 %2424, %v533_v28   ;;  %v554_v32 = vld [vmem:[%s3013_s1 + $0x160] sm:$0xff]  ;;  %v553_v33 = vld [vmem:[%s3013_s1 + $0x158] sm:$0xff]  ;;  %v2559_v38 = vld [vmem:[%s3013_s1 + $0x48] ss:$0 sm:$0xff] }
   0x8   :  { %v546_v34 = vld [vmem:[%s3013_s1 + $0x120] sm:$0xff]  ;;  %v545_v35 = vld [vmem:[%s3013_s1 + $0x118] sm:$0xff]  ;;  %v2570_v42 = vld [vmem:[%s3013_s1 + $0x50] sm:$0xff] }
   0x9   :  { %2332 = vmatpush3.bf16.msra.mxu0 %v2329_v5  ;;  %v558_v36 = vld [vmem:[%s3013_s1 + $0x180] sm:$0xff]  ;;  %v557_v37 = vld [vmem:[%s3013_s1 + $0x178] sm:$0xff]  ;;  %v2580_v47 = vld [vmem:[%s3013_s1 + $0x68] sm:$0xff] }
   0xa   :  { %2334 = vmatprep.subr.bf16.mxu0 %v2333_v9  ;;  %724 = vperm.xlu1 %2425, %v536_v30   ;;  %v2564_v39 = vld [vmem:[%s3013_s1 + $0x58] sm:$0xff]  ;;  %v530_v49 = vld [vmem:[%s3013_s1 + $0xa0] sm:$0xff]  ;;  %v531_v51 = vld [vmem:[%s3013_s1 + $0xa8] sm:$0xff] }
   0xb   :  { %714 = vperm.xlu0 %2424, %v534_v31   ;;  %v529_v48 = vld [vmem:[%s3013_s1 + $0x98] sm:$0xff]  ;;  %v532_v52 = vld [vmem:[%s3013_s1 + $0xb0] sm:$0xff]  ;;  %v555_v55 = vld [vmem:[%s3013_s1 + $0x168] sm:$0xff] }
   0xc   :  { %v2353_v50 = vpack.c.bf16 %v530_v49, %v529_v48  ;;  %v2357_v53 = vpack.c.bf16 %v532_v52, %v531_v51  ;;  %v556_v54 = vld [vmem:[%s3013_s1 + $0x170] sm:$0xff]  ;;  %v547_v57 = vld [vmem:[%s3013_s1 + $0x128] sm:$0xff]  ;;  %v2645_v3 = vld [vmem:[%s3013_s1 + $0x80] sm:$0xff] }
   0xd   :  { %2336 = vmatpush3.bf16.msra.mxu0 %v2333_v9  ;;  %v548_v56 = vld [vmem:[%s3013_s1 + $0x130] sm:$0xff]  ;;  %v559_v59 = vld [vmem:[%s3013_s1 + $0x188] sm:$0xff]  ;;  %v2656_v7 = vld [vmem:[%s3013_s1 + $0x78] sm:$0xff] }
   0xe   :  { %568 = vperm.xlu1 %2425, %v554_v32   ;;  %2354 = vmatprep.subr.bf16.mxu0 %v2353_v50  ;;  %v560_v58 = vld [vmem:[%s3013_s1 + $0x190] sm:$0xff]  ;;  %v2630_v62 = vld [vmem:[%s3013_s1 + $0x88] ss:$0 sm:$0xff]  ;;  %v541_v27 = vld [vmem:[%s3013_s1 + $0xf8] sm:$0xff] }
   0xf   :  { %563 = vperm.xlu0 %2424, %v553_v33   ;;  %v2638_v0 = vld [vmem:[%s3013_s1 + $0x70] ss:$0 sm:$0xff]  ;;  %v542_v28 = vld [vmem:[%s3013_s1 + $0x100] sm:$0xff]  ;;  %v543_v30 = vld [vmem:[%s3013_s1 + $0x108] sm:$0xff] }
  0x10   :  { %2170 = vmatmul.mubr.msk.f32.vlgmr.msra.gmra.mrb[0].mxu0 %vm26_vm0, %v12_v10  ;;  %v2650_v5 = vld [vmem:[%s3013_s1 + $0x90] ss:$0 sm:$0xff]  ;;  %v2361_v29 = vpack.c.bf16 %v542_v28, %v541_v27  ;;  %v1284_v33 = vld [vmem:[%s3013_s1 + $0x218] sm:$0xff]  ;;  %v1309_v48 = vld [vmem:[%s3013_s1 + $0x2e0] sm:$0xff] }
  0x11   :  { %2172 = vmatprep.mubr.msk.f32.mxu0 %vm26_vm0, %v13_v12  ;;  %2356 = vmatpush3.bf16.msra.mxu0 %v2353_v50  ;;  %v544_v31 = vld [vmem:[%s3013_s1 + $0x110] sm:$0xff]  ;;  %v538_v51 = vld [vmem:[%s3013_s1 + $0xe0] sm:$0xff] }
  0x12   :  { %851 = vperm.xlu1 %2425, %v546_v34   ;;  %2358 = vmatprep.subr.bf16.mxu0 %v2357_v53  ;;  %v2365_v32 = vpack.c.bf16 %v544_v31, %v543_v30  ;;  %v1285_v34 = vld [vmem:[%s3013_s1 + $0x220] sm:$0xff]  ;;  %v549_v30 = vld [vmem:[%s3013_s1 + $0x138] sm:$0xff] }
  0x13   :  { %846 = vperm.xlu0 %2424, %v545_v35   ;;  %v1286_v35 = vld [vmem:[%s3013_s1 + $0x228] sm:$0xff] }
  0x14   :  { %2173 = vmatmul.mubr.msk.f32.gmra.mrb[2].mxu0 %vm26_vm0, %v14_v13 }
  0x15   :  { %2360 = vmatpush3.bf16.msra.mxu0 %v2357_v53 }
  0x16   :  { %592 = vperm.xlu1 %2425, %v558_v36   ;;  %v1287_v36 = vld [vmem:[%s3013_s1 + $0x230] sm:$0xff] }
  0x17   :  { %587 = vperm.xlu0 %2424, %v557_v37   ;;  %v1306_v37 = vld [vmem:[%s3013_s1 + $0x2c8] sm:$0xff] }
  0x1a   :  { %578 = vperm.xlu1 %2425, %v556_v54  }
  0x1b   :  { %573 = vperm.xlu0 %2424, %v555_v55   ;;  %v537_v55 = vld [vmem:[%s3013_s1 + $0xd8] sm:$0xff] }
  0x1e   :  { %861 = vperm.xlu1 %2425, %v548_v56  }
  0x1f   :  { %856 = vperm.xlu0 %2424, %v547_v57  }
  0x22   :  { %602 = vperm.xlu1 %2425, %v560_v58  }
  0x23   :  { %597 = vperm.xlu0 %2424, %v559_v59  }
  0x26   :  { %1464 = vperm.xlu1 %2425, %v1285_v34  }
  0x27   :  { %1459 = vperm.xlu0 %2424, %v1284_v33  }
  0x2a   :  { %1474 = vperm.xlu1 %2425, %v1287_v36  }
  0x2b   :  { %1469 = vperm.xlu0 %2424, %v1286_v35  }
  0x2f   :  { %1324 = vperm.xlu0 %2424, %v1306_v37   ;;  %v540_v37 = vld [vmem:[%s3013_s1 + $0xf0] sm:$0xff] }
  0x86   :  { %v710_v49 = vpop.permute.xlu0 %709 }
  0x8a   :  { %v715_v50 = vpop.permute.xlu0 %714 }
  0xe3   :  { %v2171_v15 = vpop.f32.mrb[0].mxu0 }
  0xe4   :  { %v2492_v16 = vadd.f32 %v2171_v15, %v1959_v14  ;;  %v105_v17 = vpop.f32.mrb[1].mxu0 }
  0xe5   :  { %v2494_v18 = vadd.f32 %v1959_v14, %v105_v17 }
  0xe6   :  { %vm125_vm2 = vcmp.ge.f32.partialorder %v2492_v16, 1.0 }
  0xe7   :  { %vm124_vm3 = vcmp.ge.f32.partialorder %v2494_v18, 1.0  ;;  %v2174_v21 = vpop.f32.mrb[2].mxu0  ;;  %v1965_v61 = vsel %vm125_vm2, 1.0, %v2430_v60 }
  0xe8   :  { %vm2337_vm4 = vmpackc.low %vm125_vm2, %vm124_vm3  ;;  %v2508_v22 = vadd.f32 %v2174_v21, %v1959_v14  ;;  %v115_v23 = vpop.f32.mrb[3].mxu0  ;;  %v1964_v63 = vsel %vm124_vm3, 1.0, %v2430_v60  ;;  %v153_v1 = vmul.f32 %v2630_v62, %v1965_v61 }
  0xe9   :  { %2338 = vmatprep.subr.msk.bf16.mxu1 %vm2337_vm4, %v2428_v19  ;;  %v2510_v24 = vadd.f32 %v1959_v14, %v115_v23  ;;  %v152_v2 = vmul.f32 %v2630_v62, %v1964_v63 }
  0xea   :  { %2340 = vmatpush3.bf16.msk.msra.mxu1 %vm2337_vm4, %v2428_v19  ;;  %vm127_vm5 = vcmp.ge.f32.partialorder %v2508_v22, 1.0 }
  0xeb   :  { %vm126_vm6 = vcmp.ge.f32.partialorder %v2510_v24, 1.0  ;;  %v160_v13 = vadd.f32 %v2650_v5, %v152_v2  ;;  %v1967_v53 = vsel %vm127_vm5, 1.0, %v2430_v60 }
  0xec   :  { %vm2521_vm7 = vmpackc.low %vm127_vm5, %vm126_vm6  ;;  %v1966_v57 = vsel %vm126_vm6, 1.0, %v2430_v60  ;;  %v155_v61 = vmul.f32 %v2630_v62, %v1967_v53 }
  0xed   :  { %2180 = vmatmul.mubr.msk.f32.vlgmr.msra.gmra.mrb[0].mxu1 %vm164_vm1, %v137_v20 }
  0xee   :  { %2186 = vmatprep.mubr.msk.f32.mxu1 %vm164_vm1, %v141_v25 }
 0x1c0   :  { %v2181_v40 = vpop.f32.mrb[0].mxu1 }
 0x1c1   :  { %v251_v41 = vmul.f32 %v2181_v40, %v2559_v38  ;;  %v237_v43 = vpop.f32.mrb[1].mxu1  ;;  %v1299_v40 = vld [vmem:[%s3013_s1 + $0x290] sm:$0xff] }
 0x1c2   :  { %v250_v44 = vmul.f32 %v2559_v38, %v237_v43  ;;  %v1310_v43 = vld [vmem:[%s3013_s1 + $0x2e8] sm:$0xff] }
 0x1c3   :  { %v253_v45 = vadd.f32 %v251_v41, %v2564_v39  ;;  %v1304_v41 = vld [vmem:[%s3013_s1 + $0x2b8] sm:$0xff] }
 0x1c4   :  { %v252_v46 = vadd.f32 %v250_v44, %v2570_v42  ;;  %v1311_v44 = vld [vmem:[%s3013_s1 + $0x2f0] sm:$0xff] }
 0x1c5   :  { %vm255_vm8 = vcmp.ge.f32.partialorder %v253_v45, 2.0  ;;  %v1296_v45 = vld [vmem:[%s3013_s1 + $0x278] sm:$0xff] }
 0x1c6   :  { %vm254_vm9 = vcmp.ge.f32.partialorder %v252_v46, 2.0  ;;  %v1297_v46 = vld [vmem:[%s3013_s1 + $0x280] sm:$0xff] }
 0x1c7   :  { %vm2341_vm10 = vmpackc.low %vm255_vm8, %vm254_vm9 }
 0x1c8   :  { %2342 = vmatprep.subr.msk.bf16.mxu1 %vm2341_vm10, %v2428_v19 }
 0x1c9   :  { %2344 = vmatpush3.bf16.msk.msra.mxu1 %vm2341_vm10, %v2428_v19 }
 0x1ca   :  { %2346 = vmatprep.subr.msk.bf16.mxu1 %vm2521_vm7, %v2428_v19 }
 0x1cc   :  { %2187 = vmatmul.mubr.msk.f32.vlgmr.msra.gmra.mrb[2].mxu1 %vm164_vm1, %v2580_v47 }
 0x1cd   :  { %2348 = vmatpush3.bf16.msk.msra.mxu1 %vm2521_vm7, %v2428_v19  ;;  %2193 = vmatprep.mubr.msk.f32.mxu1 %vm164_vm1, %v2477_v11  ;;  %v161_v11 = vadd.f32 %v2650_v5, %v153_v1  ;;  %v154_v1 = vmul.f32 %v2630_v62, %v1966_v57  ;;  %v552_v57 = vld [vmem:[%s3013_s1 + $0x150] sm:$0xff] }
 0x1d0   :  { %2194 = vmatmul.mubr.msk.f32.vlgmr.msra.gmra.mrb[4].mxu1 %vm164_vm1, %v137_v20 }
 0x1d1   :  { %2200 = vmatprep.mubr.msk.f32.mxu1 %vm164_vm1, %v141_v25 }
 0x29f   :  { %v2188_v4 = vpop.f32.mrb[2].mxu1 }
 0x2a0   :  { %v346_v6 = vmul.f32 %v2188_v4, %v2638_v0  ;;  %v332_v8 = vpop.f32.mrb[3].mxu1 }
 0x2a1   :  { %v345_v9 = vmul.f32 %v2638_v0, %v332_v8 }
 0x2a2   :  { %v348_v10 = vadd.f32 %v346_v6, %v2645_v3 }
 0x2a3   :  { %v347_v12 = vadd.f32 %v345_v9, %v2656_v7  ;;  %v2195_v14 = vpop.f32.mrb[4].mxu1 }
 0x2a4   :  { %v514_v15 = vadd.f32 %v348_v10, %v161_v11  ;;  %v425_v16 = vmul.f32 %v2195_v14, %v2559_v38  ;;  %v415_v17 = vpop.f32.mrb[5].mxu1  ;;  %v163_v10 = vadd.f32 %v2650_v5, %v155_v61  ;;  %v162_v11 = vadd.f32 %v2650_v5, %v154_v1 }
 0x2a5   :  { %v513_v18 = vadd.f32 %v347_v12, %v160_v13  ;;  %v424_v20 = vmul.f32 %v2559_v38, %v415_v17  ;;  %v1307_v38 = vld [vmem:[%s3013_s1 + $0x2d0] sm:$0xff] }
 0x2a6   :  { %vm518_vm11 = vcmp.ge.f32.partialorder %v514_v15, 2.0  ;;  %v427_v21 = vadd.f32 %v425_v16, %v2564_v39  ;;  %1329 = vperm.xlu1 %2425, %v1307_v38   ;;  %v1298_v39 = vld [vmem:[%s3013_s1 + $0x288] sm:$0xff] }
 0x2a7   :  { %vm517_vm13 = vcmp.ge.f32.partialorder %v513_v18, 2.0  ;;  %v426_v23 = vadd.f32 %v424_v20, %v2570_v42  ;;  %v2671_v26 = vsel %vm518_vm11, 1.0, %v2430_v60  ;;  %1606 = vperm.xlu0 %2424, %v1298_v39   ;;  %v1305_v42 = vld [vmem:[%s3013_s1 + $0x2c0] sm:$0xff] }
 0x2a8   :  { %v2668_v25 = vsel %vm517_vm13, 1.0, %v2430_v60  ;;  %vm429_vm14 = vcmp.ge.f32.partialorder %v427_v21, 2.0 }
 0x2a9   :  { %vm428_vm15 = vcmp.ge.f32.partialorder %v426_v23, 2.0  ;;  %2211 = vmatprep.mubr.msk.f32.mxu0 %vm609_vm12, %v2668_v25  ;;  %v550_v23 = vld [vmem:[%s3013_s1 + $0x140] sm:$0xff] }
 0x2aa   :  { %2212 = vmatmul.mubr.msk.f32.vlgmr.msra.gmra.mrb[4].mxu0 %vm609_vm12, %v2671_v26  ;;  %vm2349_vm0 = vmpackc.low %vm429_vm14, %vm428_vm15  ;;  %1611 = vperm.xlu1 %2425, %v1299_v40   ;;  %v539_v40 = vld [vmem:[%s3013_s1 + $0xe8] sm:$0xff] }
 0x2ab   :  { %2350 = vmatprep.subr.msk.bf16.mxu1 %vm2349_vm0, %v2428_v19  ;;  %1314 = vperm.xlu0 %2424, %v1304_v41  }
 0x2ac   :  { %2352 = vmatpush3.bf16.msk.msra.mxu1 %vm2349_vm0, %v2428_v19 }
 0x2ad   :  { %2362 = vmatprep.subr.bf16.mxu1 %v2361_v29 }
 0x2ae   :  { %1319 = vperm.xlu1 %2425, %v1305_v42  }
 0x2af   :  { %2201 = vmatmul.mubr.msk.f32.vlgmr.msra.gmra.mrb[6].mxu1 %vm164_vm1, %v2580_v47  ;;  %1348 = vperm.xlu0 %2424, %v1310_v43   ;;  %v1308_v47 = vld [vmem:[%s3013_s1 + $0x2d8] sm:$0xff] }
 0x2b0   :  { %2364 = vmatpush3.bf16.msra.mxu1 %v2361_v29 }
 0x2b1   :  { %2366 = vmatprep.subr.bf16.mxu1 %v2365_v32 }
 0x2b2   :  { %1353 = vperm.xlu1 %2425, %v1311_v44  }
 0x2b3   :  { %1596 = vperm.xlu0 %2424, %v1296_v45  }
 0x2b4   :  { %2368 = vmatpush3.bf16.msra.mxu1 %v2365_v32 }
 0x2b6   :  { %1601 = vperm.xlu1 %2425, %v1297_v46   ;;  %v888_v46 = vld [vmem:[%s3013_s1 + $0x198] sm:$0xff] }
 0x2b7   :  { %1338 = vperm.xlu0 %2424, %v1308_v47  }
 0x2ba   :  { %1343 = vperm.xlu1 %2425, %v1309_v48   ;;  %v889_v48 = vld [vmem:[%s3013_s1 + $0x1a0] sm:$0xff] }
 0x37d   :  { %v2213_v52 = vpop.f32.mrb[4].mxu0 }
 0x37e   :  { %v728_v54 = vmul.f32 %v2213_v52, %v715_v50  ;;  %v688_v56 = vpop.f32.mrb[5].mxu0 }
 0x37f   :  { %v727_v58 = vmul.f32 %v710_v49, %v688_v56  ;;  %v893_v49 = vld [vmem:[%s3013_s1 + $0x1c0] sm:$0xff] }
 0x380   :  { %v732_v59 = vadd.f32 %v728_v54, %v538_v51 }
 0x381   :  { %v731_v63 = vadd.f32 %v727_v58, %v537_v55 }
 0x382   :  { %vm736_vm2 = vcmp.ge.f32.partialorder %v732_v59, 2.0  ;;  %v2202_v22 = vpop.f32.mrb[6].mxu1 }
 0x383   :  { %vm735_vm3 = vcmp.ge.f32.partialorder %v731_v63, 2.0  ;;  %v510_v2 = vmul.f32 %v2202_v22, %v2638_v0  ;;  %v500_v4 = vpop.f32.mrb[7].mxu1  ;;  %v2001_v24 = vsel %vm736_vm2, 1.0, %v2430_v60  ;;  %v551_v63 = vld [vmem:[%s3013_s1 + $0x148] sm:$0xff] }
 0x384   :  { %v509_v6 = vmul.f32 %v2638_v0, %v500_v4  ;;  %v2000_v8 = vsel %vm735_vm3, 1.0, %v2430_v60 }
 0x385   :  { %v512_v9 = vadd.f32 %v510_v2, %v2645_v3  ;;  %2225 = vmatprep.mubr.msk.f32.mxu1 %vm609_vm12, %v2000_v8  ;;  %v720_v3 = vpop.permute.xlu1 %719  ;;  %v2018_v2 = vld [vmem:[%s3013_s1 + $0x1a8] ss:$0 sm:$0xff] }
 0x386   :  { %v511_v62 = vadd.f32 %v509_v6, %v2656_v7  ;;  %2226 = vmatmul.mubr.msk.f32.vlgmr.msra.gmra.mrb[8].mxu1 %vm609_vm12, %v2001_v24  ;;  %v564_v7 = vpop.permute.xlu0 %563 }
 0x387   :  { %v516_v12 = vadd.f32 %v512_v9, %v163_v10  ;;  %v581_v20 = vmul.f32 %v2668_v25, %v564_v7  ;;  %v892_v9 = vld [vmem:[%s3013_s1 + $0x1b8] sm:$0xff] }
 0x388   :  { %v515_v13 = vadd.f32 %v511_v62, %v162_v11  ;;  %v1280_v7 = vld [vmem:[%s3013_s1 + $0x1f8] sm:$0xff] }
 0x389   :  { %vm520_vm4 = vcmp.ge.f32.partialorder %v516_v12, 2.0  ;;  %v725_v15 = vpop.permute.xlu1 %724  ;;  %v891_v12 = vld [vmem:[%s3013_s1 + $0x1b0] sm:$0xff] }
 0x38a   :  { %vm519_vm5 = vcmp.ge.f32.partialorder %v515_v13, 2.0  ;;  %v1995_v14 = vsel %vm520_vm4, 1.0, %v2430_v60  ;;  %v847_v5 = vpop.permute.xlu0 %846 }
 0x38b   :  { %v1994_v0 = vsel %vm519_vm5, 1.0, %v2430_v60 }
 0x38c   :  { %2214 = vmatprep.mubr.msk.f32.mxu0 %vm609_vm12, %v1994_v0 }
 0x38d   :  { %2215 = vmatmul.mubr.msk.f32.gmra.mrb[6].mxu0 %vm609_vm12, %v1995_v14  ;;  %v569_v16 = vpop.permute.xlu1 %568 }
 0x38e   :  { %v582_v18 = vmul.f32 %v2671_v26, %v569_v16  ;;  %v588_v28 = vpop.permute.xlu0 %587  ;;  %2242 = vmatprep.mubr.msk.f32.mxu0 %vm164_vm1, %v893_v49  ;;  %v894_v16 = vld [vmem:[%s3013_s1 + $0x1c8] sm:$0xff] }
 0x38f   :  { %v605_v35 = vadd.f32 %v588_v28, %v581_v20  ;;  %v1283_v20 = vld [vmem:[%s3013_s1 + $0x210] sm:$0xff] }
 0x391   :  { %v852_v17 = vpop.permute.xlu1 %851 }
 0x392   :  { %v574_v51 = vpop.permute.xlu0 %573 }
 0x393   :  { %v583_v55 = vmul.f32 %v1994_v0, %v574_v51  ;;  %v1292_v51 = vld [vmem:[%s3013_s1 + $0x258] sm:$0xff] }
 0x395   :  { %v593_v21 = vpop.permute.xlu1 %592 }
 0x396   :  { %v606_v33 = vadd.f32 %v593_v21, %v582_v18  ;;  %v857_v53 = vpop.permute.xlu0 %856  ;;  %v1282_v18 = vld [vmem:[%s3013_s1 + $0x208] sm:$0xff] }
 0x397   :  { %v2389_v21 = vpack.c.bf16 %v1283_v20, %v1282_v18 }
 0x399   :  { %v579_v50 = vpop.permute.xlu1 %578 }
 0x39a   :  { %v584_v54 = vmul.f32 %v1995_v14, %v579_v50  ;;  %v598_v59 = vpop.permute.xlu0 %597 }
 0x39b   :  { %v607_v8 = vadd.f32 %v598_v59, %v583_v55  ;;  %v1295_v55 = vld [vmem:[%s3013_s1 + $0x270] sm:$0xff] }
 0x39d   :  { %v862_v52 = vpop.permute.xlu1 %861 }
 0x3a1   :  { %v603_v56 = vpop.permute.xlu1 %602 }
 0x3a2   :  { %v608_v4 = vadd.f32 %v603_v56, %v584_v54  ;;  %v1294_v54 = vld [vmem:[%s3013_s1 + $0x268] sm:$0xff] }
 0x3a3   :  { %v2397_v56 = vpack.c.bf16 %v1295_v55, %v1294_v54 }
 0x459   :  { %v2227_v27 = vpop.f32.mrb[8].mxu1 }
 0x45a   :  { %v865_v29 = vmul.f32 %v2227_v27, %v852_v17  ;;  %v825_v31 = vpop.f32.mrb[9].mxu1  ;;  %v1281_v17 = vld [vmem:[%s3013_s1 + $0x200] sm:$0xff]  ;;  %v2012_v27 = vld [vmem:[%s3013_s1 + $0x1e8] ss:$0 sm:$0xff] }
 0x45b   :  { %v864_v32 = vmul.f32 %v847_v5, %v825_v31  ;;  %v2385_v5 = vpack.c.bf16 %v1281_v17, %v1280_v7 }
 0x45c   :  { %v869_v34 = vadd.f32 %v865_v29, %v550_v23 }
 0x45d   :  { %v868_v26 = vadd.f32 %v864_v32, %v549_v30  ;;  %v2025_v30 = vld [vmem:[%s3013_s1 + $0x1d0] ss:$0 sm:$0xff] }
 0x45e   :  { %v2777_v36 = vadd.f32 %v869_v34, %v606_v33 }
 0x45f   :  { %v2779_v25 = vadd.f32 %v868_v26, %v605_v35  ;;  %v897_v26 = vld [vmem:[%s3013_s1 + $0x1e0] sm:$0xff] }
 0x460   :  { %v2216_v38 = vpop.f32.mrb[6].mxu0  ;;  %vm877_vm6 = vcmp.ge.f32.partialorder %v2777_v36, 2.0  ;;  %v2013_v36 = vld [vmem:[%s3013_s1 + $0x1f0] ss:$0 sm:$0xff] }
 0x461   :  { %v730_v39 = vmul.f32 %v2216_v38, %v725_v15  ;;  %v698_v41 = vpop.f32.mrb[7].mxu0  ;;  %vm876_vm7 = vcmp.ge.f32.partialorder %v2779_v25, 2.0  ;;  %v2009_v23 = vsel %vm877_vm6, 1.0, %v2430_v60 }
 0x462   :  { %v729_v42 = vmul.f32 %v720_v3, %v698_v41  ;;  %vm2369_vm8 = vmpackc.low %vm877_vm6, %vm876_vm7  ;;  %v2008_v28 = vsel %vm876_vm7, 1.0, %v2430_v60  ;;  %v905_v31 = vmul.f32 %v2012_v27, %v2009_v23 }
 0x463   :  { %v734_v43 = vadd.f32 %v730_v39, %v540_v37  ;;  %2370 = vmatprep.subr.msk.bf16.mxu1 %vm2369_vm8, %v2428_v19  ;;  %v904_v34 = vmul.f32 %v2012_v27, %v2008_v28  ;;  %v896_v39 = vld [vmem:[%s3013_s1 + $0x1d8] sm:$0xff] }
 0x464   :  { %v733_v44 = vadd.f32 %v729_v42, %v539_v40  ;;  %2372 = vmatpush3.bf16.msk.msra.mxu1 %vm2369_vm8, %v2428_v19 }
 0x465   :  { %vm738_vm9 = vcmp.ge.f32.partialorder %v734_v43, 2.0  ;;  %v913_v43 = vadd.f32 %v2013_v36, %v905_v31 }
 0x466   :  { %vm737_vm10 = vcmp.ge.f32.partialorder %v733_v44, 2.0  ;;  %v2003_v47 = vsel %vm738_vm9, 1.0, %v2430_v60 }
 0x467   :  { %v2002_v45 = vsel %vm737_vm10, 1.0, %v2430_v60 }
 0x468   :  { %2228 = vmatprep.mubr.msk.f32.mxu1 %vm609_vm12, %v2002_v45  ;;  %v912_v45 = vadd.f32 %v2013_v36, %v904_v34 }
 0x469   :  { %2229 = vmatmul.mubr.msk.f32.gmra.mrb[10].mxu1 %vm609_vm12, %v2003_v47 }
 0x46a   :  { %2235 = vmatprep.mubr.msk.f32.mxu1 %vm164_vm1, %v888_v46 }
 0x46d   :  { %2236 = vmatmul.mubr.msk.f32.vlgmr.msra.gmra.mrb[12].mxu1 %vm164_vm1, %v889_v48 }
 0x46e   :  { %2249 = vmatprep.mubr.msk.f32.mxu1 %vm164_vm1, %v888_v46 }
 0x53c   :  { %v2230_v58 = vpop.f32.mrb[10].mxu1 }
 0x53d   :  { %v867_v61 = vmul.f32 %v2230_v58, %v862_v52  ;;  %v835_v1 = vpop.f32.mrb[11].mxu1  ;;  %v1293_v52 = vld [vmem:[%s3013_s1 + $0x260] sm:$0xff] }
 0x53e   :  { %v866_v22 = vmul.f32 %v857_v53, %v835_v1  ;;  %v2393_v53 = vpack.c.bf16 %v1293_v52, %v1292_v51 }
 0x53f   :  { %v871_v6 = vadd.f32 %v867_v61, %v552_v57  ;;  %v1465_v61 = vpop.permute.xlu1 %1464 }
 0x540   :  { %v870_v24 = vadd.f32 %v866_v22, %v551_v63  ;;  %v2237_v10 = vpop.f32.mrb[12].mxu1 }
 0x541   :  { %v2824_v62 = vadd.f32 %v871_v6, %v608_v4  ;;  %v1002_v11 = vmul.f32 %v2237_v10, %v2018_v2  ;;  %v988_v13 = vpop.f32.mrb[13].mxu1  ;;  %v1289_v4 = vld [vmem:[%s3013_s1 + $0x240] sm:$0xff]  ;;  %v1288_v10 = vld [vmem:[%s3013_s1 + $0x238] sm:$0xff] }
 0x542   :  { %v2829_v0 = vadd.f32 %v870_v24, %v607_v8  ;;  %v1001_v14 = vmul.f32 %v2018_v2, %v988_v13  ;;  %v1460_v8 = vpop.permute.xlu0 %1459 }
 0x543   :  { %v1004_v3 = vadd.f32 %v1002_v11, %v892_v9  ;;  %vm879_vm11 = vcmp.ge.f32.partialorder %v2824_v62, 2.0  ;;  %v1475_v23 = vpop.permute.xlu1 %1474 }
 0x544   :  { %v1003_v15 = vadd.f32 %v1001_v14, %v891_v12  ;;  %vm878_vm13 = vcmp.ge.f32.partialorder %v2829_v0, 2.0  ;;  %v2011_v57 = vsel %vm879_vm11, 1.0, %v2430_v60 }
 0x545   :  { %vm1006_vm14 = vcmp.ge.f32.partialorder %v1004_v3, 2.0  ;;  %vm2377_vm15 = vmpackc.low %vm879_vm11, %vm878_vm13  ;;  %v2010_v58 = vsel %vm878_vm13, 1.0, %v2430_v60  ;;  %v907_v59 = vmul.f32 %v2012_v27, %v2011_v57 }
 0x546   :  { %vm1005_vm0 = vcmp.ge.f32.partialorder %v1003_v15, 2.0  ;;  %2378 = vmatprep.subr.msk.bf16.mxu1 %vm2377_vm15, %v2428_v19  ;;  %v906_v63 = vmul.f32 %v2012_v27, %v2010_v58  ;;  %v1470_v27 = vpop.permute.xlu0 %1469 }
 0x547   :  { %2380 = vmatpush3.bf16.msk.msra.mxu1 %vm2377_vm15, %v2428_v19  ;;  %vm2373_vm2 = vmpackc.low %vm1006_vm14, %vm1005_vm0  ;;  %v915_v11 = vadd.f32 %v2013_v36, %v907_v59  ;;  %v1330_v28 = vpop.permute.xlu1 %1329 }
 0x548   :  { %2374 = vmatprep.subr.msk.bf16.mxu0 %vm2373_vm2, %v2428_v19  ;;  %2386 = vmatprep.subr.bf16.mxu1 %v2385_v5  ;;  %v914_v0 = vadd.f32 %v2013_v36, %v906_v63 }
 0x549   :  { %2376 = vmatpush3.bf16.msk.msra.mxu0 %vm2373_vm2, %v2428_v19 }
 0x54a   :  { %2250 = vmatmul.mubr.msk.f32.vlgmr.msra.gmra.mrb[14].mxu1 %vm164_vm1, %v889_v48 }
 0x54b   :  { %2388 = vmatpush3.bf16.msra.mxu1 %v2385_v5 }
 0x54c   :  { %2243 = vmatmul.mubr.msk.f32.vlgmr.msra.gmra.mrb[8].mxu0 %vm164_vm1, %v894_v16  ;;  %2390 = vmatprep.subr.bf16.mxu1 %v2389_v21 }
 0x54d   :  { %2256 = vmatprep.mubr.msk.f32.mxu0 %vm164_vm1, %v893_v49 }
 0x54f   :  { %2392 = vmatpush3.bf16.msra.mxu1 %v2389_v21  ;;  %v2431_v21 = vmov 0.0|0.0  }
 0x550   :  { %2401 = vmatprep.subr.bf16.mxu1 %v2431_v21 }
 0x61d   :  { %v2251_v29 = vpop.f32.mrb[14].mxu1 }
 0x61e   :  { %v1176_v32 = vmul.f32 %v2251_v29, %v2018_v2  ;;  %v1166_v33 = vpop.f32.mrb[15].mxu1  ;;  %v1325_v29 = vpop.permute.xlu0 %1324 }
 0x61f   :  { %v1175_v35 = vmul.f32 %v2018_v2, %v1166_v33  ;;  %v2244_v25 = vpop.f32.mrb[8].mxu0 }
 0x620   :  { %v1178_v37 = vadd.f32 %v1176_v32, %v892_v9  ;;  %v1097_v38 = vmul.f32 %v2244_v25, %v2025_v30  ;;  %v1083_v40 = vpop.f32.mrb[9].mxu0 }
 0x621   :  { %v1177_v41 = vadd.f32 %v1175_v35, %v891_v12  ;;  %v1096_v42 = vmul.f32 %v2025_v30, %v1083_v40 }
 0x622   :  { %vm1180_vm3 = vcmp.ge.f32.partialorder %v1178_v37, 2.0  ;;  %v1099_v44 = vadd.f32 %v1097_v38, %v897_v26  ;;  %v1607_v31 = vpop.permute.xlu0 %1606  ;;  %v1301_v38 = vld [vmem:[%s3013_s1 + $0x2a0] sm:$0xff] }
 0x623   :  { %vm1179_vm4 = vcmp.ge.f32.partialorder %v1177_v41, 2.0  ;;  %v1098_v46 = vadd.f32 %v1096_v42, %v896_v39  ;;  %v1291_v41 = vld [vmem:[%s3013_s1 + $0x250] sm:$0xff] }
 0x624   :  { %v1265_v47 = vadd.f32 %v1099_v44, %v913_v43  ;;  %vm2381_vm5 = vmpackc.low %vm1180_vm3, %vm1179_vm4  ;;  %v1300_v43 = vld [vmem:[%s3013_s1 + $0x298] sm:$0xff]  ;;  %vm2432_vm3 = vmmov 0  }
 0x625   :  { %v1264_v48 = vadd.f32 %v1098_v46, %v912_v45  ;;  %2382 = vmatprep.subr.msk.bf16.mxu0 %vm2381_vm5, %v2428_v19 }
 0x626   :  { %vm1269_vm6 = vcmp.ge.f32.partialorder %v1265_v47, 2.0  ;;  %2384 = vmatpush3.bf16.msk.msra.mxu0 %vm2381_vm5, %v2428_v19  ;;  %v1315_v33 = vpop.permute.xlu0 %1314 }
 0x627   :  { %vm1268_vm7 = vcmp.ge.f32.partialorder %v1264_v48, 2.0  ;;  %v2889_v50 = vsel %vm1269_vm6, 1.0, %v2430_v60  ;;  %2394 = vmatprep.subr.bf16.mxu0 %v2393_v53  ;;  %v1290_v48 = vld [vmem:[%s3013_s1 + $0x248] sm:$0xff] }
 0x628   :  { %v2883_v49 = vsel %vm1268_vm7, 1.0, %v2430_v60  ;;  %vm1795_vm7 = vcmask 1040384  }
 0x629   :  { %2257 = vmatmul.mubr.msk.f32.vlgmr.msra.gmra.mrb[10].mxu0 %vm164_vm1, %v894_v16  ;;  %2267 = vmatprep.mubr.msk.f32.mxu1 %vm609_vm12, %v2883_v49  ;;  %v1332_v37 = vmul.f32 %v2883_v49, %v1315_v33  ;;  %v1646_v33 = vld [vmem:[%s3013_s1 + $0x338] sm:$0xff] }
 0x62a   :  { %2268 = vmatmul.mubr.msk.f32.vlgmr.msra.gmra.mrb[16].mxu1 %vm609_vm12, %v2889_v50  ;;  %2396 = vmatpush3.bf16.msra.mxu0 %v2393_v53  ;;  %v1349_v35 = vpop.permute.xlu0 %1348 }
 0x62b   :  { %2398 = vmatprep.subr.bf16.mxu0 %v2397_v56 }
 0x62e   :  { %2400 = vmatpush3.bf16.msra.mxu0 %v2397_v56  ;;  %v1597_v36 = vpop.permute.xlu0 %1596 }
 0x62f   :  { %2404 = vmatprep.subr.bf16.mxu0 %v2431_v21 }
 0x6fc   :  { %v2258_v1 = vpop.f32.mrb[10].mxu0 }
 0x6fd   :  { %v1261_v22 = vmul.f32 %v2258_v1, %v2025_v30  ;;  %v1251_v2 = vpop.f32.mrb[11].mxu0  ;;  %v2269_v6 = vpop.f32.mrb[16].mxu1  ;;  %v1638_v1 = vld [vmem:[%s3013_s1 + $0x2f8] sm:$0x1] }
 0x6fe   :  { %v1260_v24 = vmul.f32 %v2025_v30, %v1251_v2  ;;  %v1478_v9 = vmul.f32 %v2269_v6, %v1465_v61  ;;  %v1438_v62 = vpop.f32.mrb[17].mxu1  ;;  %v1612_v30 = vpop.permute.xlu1 %1611  ;;  %v1640_v2 = vld [vmem:[%s3013_s1 + $0x308] sm:$0xff] }
 0x6ff   :  { %v1263_v12 = vadd.f32 %v1261_v22, %v897_v26  ;;  %v1477_v13 = vmul.f32 %v1460_v8, %v1438_v62  ;;  %v1639_v22 = vld [vmem:[%s3013_s1 + $0x300] sm:$0xff]  ;;  %v1302_v62 = vld [vmem:[%s3013_s1 + $0x2a8] sm:$0xff] }
 0x700   :  { %v1262_v14 = vadd.f32 %v1260_v24, %v896_v39  ;;  %v1482_v3 = vadd.f32 %v1478_v9, %v1289_v4  ;;  %v2408_v4 = vpack.c.bf16 %v1640_v2, %v1639_v22  ;;  %v1303_v24 = vld [vmem:[%s3013_s1 + $0x2b0] sm:$0xff] }
 0x701   :  { %v1267_v15 = vadd.f32 %v1263_v12, %v915_v11  ;;  %v1481_v16 = vadd.f32 %v1477_v13, %v1288_v10 }
 0x702   :  { %v1266_v7 = vadd.f32 %v1262_v14, %v914_v0  ;;  %vm1486_vm8 = vcmp.ge.f32.partialorder %v1482_v3, 2.0  ;;  %v1320_v32 = vpop.permute.xlu1 %1319 }
 0x703   :  { %vm1485_vm9 = vcmp.ge.f32.partialorder %v1481_v16, 2.0  ;;  %vm1271_vm10 = vcmp.ge.f32.partialorder %v1267_v15, 2.0  ;;  %v2045_v5 = vsel %vm1486_vm8, 1.0, %v2430_v60  ;;  %v1333_v25 = vmul.f32 %v2889_v50, %v1320_v32  ;;  %v1339_v50 = vpop.permute.xlu0 %1338 }
 0x704   :  { %v2044_v17 = vsel %vm1485_vm9, 1.0, %v2430_v60  ;;  %vm1270_vm11 = vcmp.ge.f32.partialorder %v1266_v7, 2.0  ;;  %v2927_v20 = vsel %vm1271_vm10, 1.0, %v2430_v60  ;;  %v1356_v55 = vadd.f32 %v1339_v50, %v1332_v37  ;;  %v1641_v7 = vld [vmem:[%s3013_s1 + $0x310] sm:$0xff] }
 0x705   :  { %2281 = vmatprep.mubr.msk.f32.mxu0 %vm609_vm12, %v2044_v17  ;;  %v2921_v18 = vsel %vm1270_vm11, 1.0, %v2430_v60  ;;  %v1335_v6 = vmul.f32 %v2927_v20, %v1330_v28  ;;  %v1642_v17 = vld [vmem:[%s3013_s1 + $0x318] sm:$0xff] }
 0x706   :  { %2270 = vmatprep.mubr.msk.f32.mxu1 %vm609_vm12, %v2921_v18  ;;  %2282 = vmatmul.mubr.msk.f32.vlgmr.msra.gmra.mrb[12].mxu0 %vm609_vm12, %v2045_v5  ;;  %v1354_v34 = vpop.permute.xlu1 %1353  ;;  %v1334_v8 = vmul.f32 %v2921_v18, %v1325_v29  ;;  %v2411_v5 = vpack.c.bf16 %v1642_v17, %v1641_v7 }
 0x707   :  { %2271 = vmatmul.mubr.msk.f32.gmra.mrb[18].mxu1 %vm609_vm12, %v2927_v20  ;;  %v1359_v13 = vadd.f32 %v1354_v34, %v1335_v6  ;;  %v1647_v34 = vld [vmem:[%s3013_s1 + $0x340] sm:$0xff] }
 0x708   :  { %2291 = vmatprep.mubr.msk.f32.mxu1 %vm2432_vm3, %v2430_v60  ;;  %v1358_v14 = vadd.f32 %v1349_v35, %v1334_v8  ;;  %v2417_v35 = vpack.c.bf16 %v1647_v34, %v1646_v33 }
 0x70a   :  { %v1602_v26 = vpop.permute.xlu1 %1601 }
 0x70e   :  { %v1344_v45 = vpop.permute.xlu1 %1343 }
 0x70f   :  { %v1357_v51 = vadd.f32 %v1344_v45, %v1333_v25 }
 0x7d9   :  { %v2283_v39 = vpop.f32.mrb[12].mxu0 }
 0x7da   :  { %v1615_v40 = vmul.f32 %v2283_v39, %v1602_v26  ;;  %v2272_v42 = vpop.f32.mrb[18].mxu1  ;;  %v1575_v44 = vpop.f32.mrb[13].mxu0  ;;  %v1648_v26 = vld [vmem:[%s3013_s1 + $0x348] sm:$0xff] }
 0x7db   :  { %v1480_v46 = vmul.f32 %v2272_v42, %v1475_v23  ;;  %v1614_v47 = vmul.f32 %v1597_v36, %v1575_v44  ;;  %v1448_v49 = vpop.f32.mrb[19].mxu1 }
 0x7dc   :  { %v1619_v52 = vadd.f32 %v1615_v40, %v1301_v38  ;;  %v1479_v53 = vmul.f32 %v1470_v27, %v1448_v49 }
 0x7dd   :  { %v1484_v54 = vadd.f32 %v1480_v46, %v1291_v41  ;;  %v1618_v56 = vadd.f32 %v1614_v47, %v1300_v43 }
 0x7de   :  { %v1623_v57 = vadd.f32 %v1619_v52, %v1357_v51  ;;  %v1483_v58 = vadd.f32 %v1479_v53, %v1290_v48 }
 0x7df   :  { %vm1488_vm13 = vcmp.ge.f32.partialorder %v1484_v54, 2.0  ;;  %v1622_v59 = vadd.f32 %v1618_v56, %v1356_v55 }
 0x7e0   :  { %vm1627_vm14 = vcmp.ge.f32.partialorder %v1623_v57, 2.0  ;;  %vm1487_vm15 = vcmp.ge.f32.partialorder %v1483_v58, 2.0  ;;  %v2047_v63 = vsel %vm1488_vm13, 1.0, %v2430_v60 }
 0x7e1   :  { %vm1626_vm0 = vcmp.ge.f32.partialorder %v1622_v59, 2.0  ;;  %v2046_v61 = vsel %vm1487_vm15, 1.0, %v2430_v60 }
 0x7e2   :  { %2284 = vmatprep.mubr.msk.f32.mxu0 %vm609_vm12, %v2046_v61  ;;  %vm2402_vm2 = vmpackc.low %vm1627_vm14, %vm1626_vm0 }
 0x7e3   :  { %2285 = vmatmul.mubr.msk.f32.gmra.mrb[14].mxu0 %vm609_vm12, %v2047_v63  ;;  %2403 = vmatpush3.bf16.msk.msra.mxu1 %vm2402_vm2, %v2428_v19 }
 0x7e4   :  { %2407 = vmatprep.subr.bf16.mxu1 %v2431_v21  ;;  %2298 = vmatprep.mubr.msk.f32.mxu0 %vm2432_vm3, %v2430_v60 }
 0x7e6   :  { %2292 = vmatmul.mubr.msk.f32.vlgmr.msra.gmra.mrb[20].mxu1 %vm164_vm1, %v1638_v1 }
 0x7e7   :  { %2309 = vmatprep.mubr.msk.f32.mxu1 %vm2432_vm3, %v2430_v60  ;;  %2409 = vmatpush3.bf16.msra.mxu1 %v2408_v4 }
 0x7e8   :  { %2410 = vmatprep.subr.bf16.mxu1 %v2431_v21 }
 0x7eb   :  { %2412 = vmatpush3.bf16.msra.mxu1 %v2411_v5 }
 0x8b6   :  { %v2286_v9 = vpop.f32.mrb[14].mxu0 }
 0x8b7   :  { %v1617_v10 = vmul.f32 %v2286_v9, %v1612_v30  ;;  %v1585_v11 = vpop.f32.mrb[15].mxu0  ;;  %v1644_v30 = vld [vmem:[%s3013_s1 + $0x328] sm:$0xff] }
 0x8b8   :  { %v1616_v12 = vmul.f32 %v1607_v31, %v1585_v11  ;;  %v1645_v31 = vld [vmem:[%s3013_s1 + $0x330] sm:$0xff] }
 0x8b9   :  { %v1621_v0 = vadd.f32 %v1617_v10, %v1303_v24  ;;  %v1718_v18 = vpop.f32.mrb[20].mxu1  ;;  %v2414_v32 = vpack.c.bf16 %v1645_v31, %v1644_v30 }
 0x8ba   :  { %v1620_v3 = vadd.f32 %v1616_v12, %v1302_v62  ;;  %v2293_v20 = vpop.f32.mrb[21].mxu1 }
 0x8bb   :  { %v1625_v15 = vadd.f32 %v1621_v0, %v1359_v13 }
 0x8bc   :  { %v1624_v16 = vadd.f32 %v1620_v3, %v1358_v14 }
 0x8bd   :  { %vm1629_vm4 = vcmp.ge.f32.partialorder %v1625_v15, 2.0 }
 0x8be   :  { %vm1628_vm5 = vcmp.ge.f32.partialorder %v1624_v16, 2.0 }
 0x8bf   :  { %vm2405_vm6 = vmpackc.low %vm1629_vm4, %vm1628_vm5 }
 0x8c0   :  { %2406 = vmatpush3.bf16.msk.msra.mxu0 %vm2405_vm6, %v2428_v19 }
 0x8c1   :  { %2413 = vmatprep.subr.bf16.mxu0 %v2431_v21 }
 0x8c3   :  { %2299 = vmatmul.mubr.msk.f32.vlgmr.msra.gmra.mrb[16].mxu0 %vm164_vm1, %v1638_v1  ;;  %vm1797_vm1 = vcmask 1041408  }
 0x8c4   :  { %2322 = vmatprep.mubr.msk.f32.mxu0 %vm2432_vm3, %v2430_v60  ;;  %2415 = vmatpush3.bf16.msra.mxu0 %v2414_v32 }
 0x8c5   :  { %2416 = vmatprep.subr.bf16.mxu0 %v2431_v21  ;;  %v2062_v21 = vld [vmem:[%s3013_s1 + $0x320] ss:$0 sm:$0xff] }
 0x8c8   :  { %2418 = vmatpush3.bf16.msra.mxu0 %v2417_v35 }
 0x8c9   :  { %2320 = vmatprep.subr.mxu0 %v2430_v60 }
 0x8cc   :  { %2321 = vmatpush3.msra.mxu0 %v1648_v26 }
 0x996   :  { %v1788_v19 = vpop.f32.mrb[16].mxu0 }
 0x997   :  { %v1793_v23 = vrot.slane %v1788_v19, 7  ;;  %v2300_v27 = vpop.f32.mrb[17].mxu0 }
 0x999   :  { %v1796_v28 = vsel %vm1795_vm7, %v1718_v18, %v1793_v23 }
 0x99a   :  { %v1798_v29 = vsel %vm1797_vm1, %v1796_v28, 0.0 }
 0x99b   :  { %2310 = vmatmul.mubr.msk.f32.vlgmr.msra.gmra.mrb[22].mxu1 %vm609_vm12, %v1798_v29  ;;  %vm1880_vm12 = vcmask 326656  }
 0xa6e   :  { %v1872_v36 = vpop.f32.mrb[22].mxu1 }
 0xa6f   :  { %v1873_v25 = vadd.f32 %v2062_v21, %v1872_v36  ;;  %v2311_v37 = vpop.f32.mrb[23].mxu1 }
 0xa71   :  { %v2064_v38 = vadd.f32 -2.0, %v1873_v25 }
 0xa73   :  { %2426 = vtanh.f32 %v2064_v38 }
 0xa7d   :  { %v2427_v39 = vpop.eup %2426 }
 0xa7e   :  { %v1878_v40 = vadd.f32 1.0, %v2427_v39 }
 0xa80   :  { %v1879_v41 = vmul.f32 0.5, %v1878_v40 }
 0xa82   :  { %2323 = vmatmul.mubr.msk.f32.vlgmr.msra.gmra.mrb[18].mxu0 %vm1880_vm12, %v1879_v41 }
 0xb55   :  { %v1950_v60 = vpop.f32.mrb[18].mxu0 }
 0xb56   :  { %1954 = vst [vmem:[%s3015_s2] sm:$0xff] %v1950_v60  ;;  %v2324_v42 = vpop.f32.mrb[19].mxu0 }

</bundles_post_ra>
